<compile_context>
chip_gen: v6e
topology: v6e:2x2x1
jax: 0.10.0
libtpu: 0.0.40
codegen_flags: <defaults>
</compile_context>

<pallas_src>
import jax
import jax.numpy as jnp
from jax.experimental import pallas as pl
from jax.experimental.pallas import tpu as pltpu

HIDDEN = 768    # BERT hidden size
FC1_DIM = 512
NCLASS = 3
NPAD = 128      # lane-dense padded logit width
VOCAB = 100     # stand-in vocab for the synthetic BERT pooler


def _round_up(x, m):
    return -(-x // m) * m


def classifier_head_kernel(cls_ref, w1_ref, b1_ref, w2_ref, b2_ref, out_ref):
    """fc1 -> relu -> (dropout=identity) -> fc2(padded to 128) -> log_softmax."""
    x = cls_ref[...]                                               # (tB, 768) bf16

    # fc1: bf16 x bf16 on the MXU, f32 accumulate; bias/ReLU in f32.
    h = jnp.dot(x, w1_ref[...], preferred_element_type=jnp.float32) + b1_ref[...]
    h = jnp.maximum(h, 0.0)                                        # ReLU, f32

    # dropout(p=0.1): identity at inference time.

    # fc2: (tB,512)bf16 @ (512,128)bf16 + (1,128)f32.  Padded lanes carry -1e30.
    logits = jnp.dot(h.astype(jnp.bfloat16), w2_ref[...],
                     preferred_element_type=jnp.float32) + b2_ref[...]

    # LogSoftmax over the 128-wide lane-dense logits (padded lanes ~ exp(-huge)=0).
    m = jnp.max(logits, axis=1, keepdims=True)
    shifted = logits - m
    lse = jnp.log(jnp.sum(jnp.exp(shifted), axis=1, keepdims=True))
    out_ref[...] = (shifted - lse).astype(out_ref.dtype)           # (tB, 128) bf16


def pack_head_params(w1, b1, w2, b2):
    """One-time packing: bf16 MXU weights, fc2 padded to 128 lanes."""
    w1_bf = w1.astype(jnp.bfloat16)                                # (768, 512) bf16
    w2p = jnp.zeros((FC1_DIM, NPAD), jnp.bfloat16)
    w2p = w2p.at[:, :NCLASS].set(w2.astype(jnp.bfloat16))          # (512, 128) bf16
    b2p = jnp.full((1, NPAD), -1e30, jnp.float32)
    b2p = b2p.at[:, :NCLASS].set(b2)                               # (1, 128) f32
    return w1_bf, b1, w2p, b2p


def sentiment_head(cls_hs, packed_params, *, tile_b=None):
    """Batch-gridded head: weights VMEM-resident, activations tiled over batch."""
    w1_bf, b1, w2p, b2p = packed_params
    B = cls_hs.shape[0]

    # Tile selection:
    #  * B < 16            : single small tile (multiple of 8 sublanes).
    #  * 16 <= B < 2048    : exactly 2 tiles -> both TensorCores busy on v7x.
    #  * B >= 2048         : 1024-row tiles (amortizes per-step overhead,
    #                        ~6-8 MB VMEM total, fits every generation's budget).
    if tile_b is None:
        b8 = _round_up(B, 8)
        if B < 16:
            tile_b = b8
        elif b8 >= 2048:
            tile_b = 1024
        else:
            tile_b = _round_up(pl.cdiv(b8, 2), 8)
    padded_b = _round_up(B, tile_b)

    # Cast to bf16 BEFORE padding (half-width pad copy); skip pad when aligned.
    x_bf = cls_hs.astype(jnp.bfloat16)
    if padded_b != B:
        x_bf = jnp.pad(x_bf, ((0, padded_b - B), (0, 0)))

    # Constant-index weight blocks need only a single buffer; deeper-buffer the
    # activation stream at large tiles to hide DMA latency jitter.
    act_buf = pl.Buffered(3) if tile_b >= 512 else pl.Buffered(2)
    w_buf = pl.Buffered(1)

    grid = (padded_b // tile_b,)
    out = pl.pallas_call(
        classifier_head_kernel,
        out_shape=jax.ShapeDtypeStruct((padded_b, NPAD), jnp.bfloat16),
        grid_spec=pltpu.PrefetchScalarGridSpec(
            num_scalar_prefetch=0,
            grid=grid,
            in_specs=[
                pl.BlockSpec((tile_b, HIDDEN), lambda i: (i, 0),
                             pipeline_mode=act_buf),                # activations: tiled
                pl.BlockSpec((HIDDEN, FC1_DIM), lambda i: (0, 0),
                             pipeline_mode=w_buf),                  # w1: VMEM-resident
                pl.BlockSpec((1, FC1_DIM), lambda i: (0, 0),
                             pipeline_mode=w_buf),                  # b1
                pl.BlockSpec((FC1_DIM, NPAD), lambda i: (0, 0),
                             pipeline_mode=w_buf),                  # w2 (padded)
                pl.BlockSpec((1, NPAD), lambda i: (0, 0),
                             pipeline_mode=w_buf),                  # b2 (padded)
            ],
            out_specs=pl.BlockSpec((tile_b, NPAD), lambda i: (i, 0)),
        ),
        compiler_params=pltpu.CompilerParams(
            dimension_semantics=("parallel",),                      # 2 TCs on v7x
            vmem_limit_bytes=(64 * 1024 * 1024) if tile_b > 1024 else None,
        ),
    )(x_bf, w1_bf, b1, w2p, b2p)

    # Real 3-class log-probs; cast back to f32 for the module-level interface.
    return out[:B, :NCLASS].astype(jnp.float32)


def fake_bert_pooled(sent_id, mask, emb_table):
    """Deterministic stand-in for `_, cls_hs = bert(sent_id, attention_mask=mask)`.

    Masked-mean of token embeddings followed by tanh, in plain JAX (glue).
    """
    # TODO(synk): full BERT encoder not reproduced; only the classifier head is kernelized.
    emb = emb_table[sent_id]                                       # (B, S, 768)
    m = mask.astype(jnp.float32)[..., None]                        # (B, S, 1)
    pooled = jnp.sum(emb * m, axis=1) / jnp.maximum(jnp.sum(m, axis=1), 1.0)
    return jnp.tanh(pooled)                                        # (B, 768)


def init_params(key):
    k1, k2, k3, k4, k5 = jax.random.split(key, 5)
    # nn.Linear-style init (uniform in +-1/sqrt(fan_in)), deterministic.
    lim1 = 1.0 / jnp.sqrt(HIDDEN)
    lim2 = 1.0 / jnp.sqrt(FC1_DIM)
    w1 = jax.random.uniform(k1, (HIDDEN, FC1_DIM), jnp.float32, -lim1, lim1)
    b1 = jax.random.uniform(k2, (1, FC1_DIM), jnp.float32, -lim1, lim1)
    w2 = jax.random.uniform(k3, (FC1_DIM, NCLASS), jnp.float32, -lim2, lim2)
    b2 = jax.random.uniform(k4, (1, NCLASS), jnp.float32, -lim2, lim2)
    emb_table = jax.random.normal(k5, (VOCAB, HIDDEN), jnp.float32) * 0.02
    return w1, b1, w2, b2, emb_table


if __name__ == "__main__":
    key = jax.random.PRNGKey(0)
    kp, ks, km = jax.random.split(key, 3)

    B, S = 2, 8
    sent_id = jax.random.randint(ks, (B, S), 0, VOCAB, dtype=jnp.int32)
    mask = (jax.random.uniform(km, (B, S)) > 0.2).astype(jnp.int32)

    w1, b1, w2, b2, emb_table = init_params(kp)
    packed = pack_head_params(w1, b1, w2, b2)

    # Glue (plain JAX): synthetic BERT pooled [CLS] representation.
    cls_hs = fake_bert_pooled(sent_id, mask, emb_table)            # (B, 768)

    # Hot path (Pallas kernel): fc1 + relu + fc2 + log_softmax.
    log_probs = jax.block_until_ready(sentiment_head(cls_hs, packed))
    assert log_probs.shape == (B, NCLASS)

    # Reference 1: same bf16 MXU operands / f32 accumulation in plain JAX.
    def ref_bf16_fn(x):
        rh = jnp.dot(x.astype(jnp.bfloat16), w1.astype(jnp.bfloat16),
                     preferred_element_type=jnp.float32) + b1
        rh = jnp.maximum(rh, 0.0)
        rl = jnp.dot(rh.astype(jnp.bfloat16), w2.astype(jnp.bfloat16),
                     preferred_element_type=jnp.float32) + b2
        return jax.nn.log_softmax(rl, axis=1)

    # Reference 2: full-f32 module semantics (looser tolerance due to bf16 weights/output).
    def ref_f32_fn(x):
        fr = jnp.maximum(x @ w1 + b1, 0.0) @ w2 + b2
        return jax.nn.log_softmax(fr, axis=1)

    # bf16 output quantization adds ~4e-3 absolute error; tolerances loosened accordingly.
    assert jnp.allclose(log_probs, ref_bf16_fn(cls_hs), atol=2e-2, rtol=2e-2), \
        "mismatch vs bf16-weight reference"
    assert jnp.allclose(log_probs, ref_f32_fn(cls_hs), atol=6e-2, rtol=6e-2), \
        "mismatch vs f32 reference"

    # Second check: exercises the batch-padding path and a 2-step grid
    # (B=40 -> tile_b=24, padded_b=48, grid=(2,)).
    B2 = 40
    k2a, k2b = jax.random.split(jax.random.PRNGKey(1))
    sent_id2 = jax.random.randint(k2a, (B2, S), 0, VOCAB, dtype=jnp.int32)
    mask2 = (jax.random.uniform(k2b, (B2, S)) > 0.2).astype(jnp.int32)
    cls_hs2 = fake_bert_pooled(sent_id2, mask2, emb_table)
    lp2 = jax.block_until_ready(sentiment_head(cls_hs2, packed))
    assert lp2.shape == (B2, NCLASS)
    assert jnp.allclose(lp2, ref_bf16_fn(cls_hs2), atol=2e-2, rtol=2e-2), \
        "mismatch vs bf16-weight reference (multi-tile path)"

    print("KERNEL_OK")
</pallas_src>

<mosaic_0001>
module attributes {stable_mosaic.version = 11 : i64} {
  func.func @classifier_head_kernel(%arg0: i32, %arg1: memref<8x768xbf16, #tpu.memory_space<vmem>>, %arg2: memref<768x512xbf16, #tpu.memory_space<vmem>>, %arg3: memref<1x512xf32, #tpu.memory_space<vmem>>, %arg4: memref<512x128xbf16, #tpu.memory_space<vmem>>, %arg5: memref<1x128xf32, #tpu.memory_space<vmem>>, %arg6: memref<8x128xbf16, #tpu.memory_space<vmem>>) attributes {dimension_semantics = [#tpu.dimension_semantics<parallel>], iteration_bounds = array<i64: 1>, scalar_prefetch = 0 : i64, scratch_operands = 0 : i64, tpu.core_type = #tpu.core_type<tc>, window_params = [{pipeline_mode = #tpu.pipeline_mode<double_buffered>, transform_indices = @transform_0, window_bounds = array<i64: 8, 768>}, {pipeline_mode = #tpu.pipeline_mode<synchronous>, transform_indices = @transform_1, window_bounds = array<i64: 768, 512>}, {pipeline_mode = #tpu.pipeline_mode<synchronous>, transform_indices = @transform_2, window_bounds = array<i64: 1, 512>}, {pipeline_mode = #tpu.pipeline_mode<synchronous>, transform_indices = @transform_3, window_bounds = array<i64: 512, 128>}, {pipeline_mode = #tpu.pipeline_mode<synchronous>, transform_indices = @transform_4, window_bounds = array<i64: 1, 128>}, {transform_indices = @transform_5, window_bounds = array<i64: 8, 128>}]} {
    %c0 = arith.constant 0 : index
    %c0_0 = arith.constant 0 : index
    %0 = vector.load %arg1[%c0, %c0_0] : memref<8x768xbf16, #tpu.memory_space<vmem>>, vector<8x768xbf16>
    %c0_1 = arith.constant 0 : index
    %c0_2 = arith.constant 0 : index
    %1 = vector.load %arg2[%c0_1, %c0_2] : memref<768x512xbf16, #tpu.memory_space<vmem>>, vector<768x512xbf16>
    %cst = arith.constant dense<0.000000e+00> : vector<8x512xf32>
    %2 = tpu.matmul %0, %1, %cst {dimension_numbers = #tpu.dot_dimension_numbers<[1], [0], [0], [1], [0, 0, 1, 1], [], []>} : vector<8x768xbf16>, vector<768x512xbf16>, vector<8x512xf32> -> vector<8x512xf32>
    %c0_3 = arith.constant 0 : index
    %c0_4 = arith.constant 0 : index
    %3 = vector.load %arg3[%c0_3, %c0_4] : memref<1x512xf32, #tpu.memory_space<vmem>>, vector<1x512xf32>
    %4 = vector.broadcast %3 : vector<1x512xf32> to vector<8x512xf32>
    %5 = arith.addf %2, %4 : vector<8x512xf32>
    %cst_5 = arith.constant 0.000000e+00 : f32
    %6 = vector.broadcast %cst_5 : f32 to vector<8x512xf32>
    %7 = arith.maximumf %5, %6 : vector<8x512xf32>
    %8 = arith.truncf %7 : vector<8x512xf32> to vector<8x512xbf16>
    %c0_6 = arith.constant 0 : index
    %c0_7 = arith.constant 0 : index
    %9 = vector.load %arg4[%c0_6, %c0_7] : memref<512x128xbf16, #tpu.memory_space<vmem>>, vector<512x128xbf16>
    %cst_8 = arith.constant dense<0.000000e+00> : vector<8x128xf32>
    %10 = tpu.matmul %8, %9, %cst_8 {dimension_numbers = #tpu.dot_dimension_numbers<[1], [0], [0], [1], [0, 0, 1, 1], [], []>} : vector<8x512xbf16>, vector<512x128xbf16>, vector<8x128xf32> -> vector<8x128xf32>
    %c0_9 = arith.constant 0 : index
    %c0_10 = arith.constant 0 : index
    %11 = vector.load %arg5[%c0_9, %c0_10] : memref<1x128xf32, #tpu.memory_space<vmem>>, vector<1x128xf32>
    %12 = vector.broadcast %11 : vector<1x128xf32> to vector<8x128xf32>
    %13 = arith.addf %10, %12 : vector<8x128xf32>
    %cst_11 = arith.constant dense<0xFF800000> : vector<8xf32>
    %14 = vector.multi_reduction <maximumf>, %13, %cst_11 [1] : vector<8x128xf32> to vector<8xf32>
    %15 = vector.shape_cast %14 : vector<8xf32> to vector<8x1xf32>
    %16 = vector.broadcast %15 : vector<8x1xf32> to vector<8x128xf32>
    %17 = arith.subf %13, %16 : vector<8x128xf32>
    %18 = math.exp %17 : vector<8x128xf32>
    %cst_12 = arith.constant dense<0.000000e+00> : vector<8xf32>
    %19 = vector.multi_reduction <add>, %18, %cst_12 [1] : vector<8x128xf32> to vector<8xf32>
    %20 = vector.shape_cast %19 : vector<8xf32> to vector<8x1xf32>
    %21 = math.log %20 : vector<8x1xf32>
    %22 = vector.broadcast %21 : vector<8x1xf32> to vector<8x128xf32>
    %23 = arith.subf %17, %22 : vector<8x128xf32>
    %24 = arith.truncf %23 : vector<8x128xf32> to vector<8x128xbf16>
    %c0_13 = arith.constant 0 : index
    %c0_14 = arith.constant 0 : index
    %25 = vector.load %arg6[%c0_13, %c0_14] : memref<8x128xbf16, #tpu.memory_space<vmem>>, vector<8x128xbf16>
    tpu.vector_store %arg6[%c0_13, %c0_14], %24 {strides = array<i32>} : memref<8x128xbf16, #tpu.memory_space<vmem>>, vector<8x128xbf16>,
    return
  }
  func.func @transform_0(%arg0: i32) -> (i32, i32) {
    %c0_i32 = arith.constant 0 : i32
    %c0_i32_0 = arith.constant 0 : i32
    return %arg0, %c0_i32 : i32, i32
  }
  func.func @transform_1(%arg0: i32) -> (i32, i32) {
    %c0_i32 = arith.constant 0 : i32
    %c0_i32_0 = arith.constant 0 : i32
    %c0_i32_1 = arith.constant 0 : i32
    return %c0_i32, %c0_i32_0 : i32, i32
  }
  func.func @transform_2(%arg0: i32) -> (i32, i32) {
    %c0_i32 = arith.constant 0 : i32
    %c0_i32_0 = arith.constant 0 : i32
    %c0_i32_1 = arith.constant 0 : i32
    return %c0_i32, %c0_i32_0 : i32, i32
  }
  func.func @transform_3(%arg0: i32) -> (i32, i32) {
    %c0_i32 = arith.constant 0 : i32
    %c0_i32_0 = arith.constant 0 : i32
    %c0_i32_1 = arith.constant 0 : i32
    return %c0_i32, %c0_i32_0 : i32, i32
  }
  func.func @transform_4(%arg0: i32) -> (i32, i32) {
    %c0_i32 = arith.constant 0 : i32
    %c0_i32_0 = arith.constant 0 : i32
    %c0_i32_1 = arith.constant 0 : i32
    return %c0_i32, %c0_i32_0 : i32, i32
  }
  func.func @transform_5(%arg0: i32) -> (i32, i32) {
    %c0_i32 = arith.constant 0 : i32
    %c0_i32_0 = arith.constant 0 : i32
    return %arg0, %c0_i32 : i32, i32
  }
}

</mosaic_0001>

<bundles_post_ra>
// kernel: tpu_custom_call.1
= control target key start
LH: loop header
LB: loop body
LE: loop exit
PB: predicated region body
PF: predicated region fallthrough
CT: control target
= control target key end

     0   :  { %10 = vsyncpa [#allocation3], 0  ;;  %s2706_s0 = inlined_call_operand.hbm [shape: bf16[8,768], index: 0, kind: input, shape index: {}]   ;;  %s2707_s1 = inlined_call_operand.hbm [shape: bf16[768,512], index: 1, kind: input, shape index: {}]   ;;  %s2708_s2 = inlined_call_operand.hbm [shape: f32[1,512], index: 2, kind: input, shape index: {}]   ;;  %s2709_s3 = inlined_call_operand.hbm [shape: bf16[512,128], index: 3, kind: input, shape index: {}]   ;;  %s2710_s4 = inlined_call_operand.vmem [shape: f32[1,128], index: 4, kind: input, shape index: {}]   ;;  %s2711_s5 = inlined_call_operand.hbm [shape: bf16[8,128], index: 5, kind: output, shape index: {}]  }
   0x1   :  { %11 = vsyncpa [#allocation6], 0 }
   0x2   :  { %12 = vsyncpa [#allocation9], 0 }
   0x3   :  { %13 = vsyncpa [#allocation4], 0  ;;  %s2619_s18 = smov [#allocation5]  }
   0x4   :  { %s29_s19 = sshll.u32 %s2619_s18, 4  ;;  %s30_s19 = int_to_ptr.vmem [resolvable:$true] %s29_s19 }
   0x5   :  { %s2519_s20 = scalar_lea.vmem %s30_s19, 24576  ;;  %p2524_p1 = scmp.lt.s32.totalorder %s30_s19, %s30_s19 }
   0x6   :  { %p2520_p0 = scmp.ne.s32.totalorder %s30_s19, %s2519_s20  ;;  %p2525_p2 = scmp.lt.s32.totalorder %s2519_s20, %s2519_s20 }
   0x8   :  { %p2526_p3 = por %p2525_p2, %p2524_p1 }
   0xa   :  { %p2527_p4 = pnand %p2526_p3, %p2520_p0 }
   0xc   :  { %2530 = shalt.err (!%p2527_p4)
}
   0xd   :  { %s2620_s21 = smov 256   ;;  %s2621_s22 = smov 16  }
   0xe   :  { %35 = dma.hbm_to_vmem [thread:$0]  %s2707_s1, 24576, %s30_s19, [#allocation6], %s2620_s21, %s2620_s21, %s2621_s22  }
   0xf   :  { %s2622_s25 = smov [#allocation2]   ;;  %s2623_s27 = smov [#allocation7]  }
  0x10   :  { %s20_s26 = sshll.u32 %s2622_s25, 4  ;;  %s42_s28 = sshll.u32 %s2623_s27, 4  ;;  %s21_s26 = int_to_ptr.vmem [resolvable:$true] %s20_s26  ;;  %s43_s28 = int_to_ptr.vmem [resolvable:$true] %s42_s28 }
  0x11   :  { %s2539_s29 = scalar_lea.vmem %s21_s26, 384  ;;  %p2544_p6 = scmp.lt.s32.totalorder %s21_s26, %s21_s26 }
  0x12   :  { %p2540_p5 = scmp.ne.s32.totalorder %s21_s26, %s2539_s29  ;;  %p2545_p7 = scmp.lt.s32.totalorder %s2539_s29, %s2539_s29 }
  0x14   :  { %p2546_p8 = por %p2545_p7, %p2544_p6 }
  0x16   :  { %p2547_p9 = pnand %p2546_p8, %p2540_p5 }
  0x18   :  { %2550 = shalt.err (!%p2547_p9)
}
  0x19   :  { %23 = dma.hbm_to_vmem [thread:$0]  %s2706_s0, 384, %s21_s26, [#allocation3]  }
  0x1a   :  { %s2559_s7 = scalar_lea.vmem %s43_s28, 64  ;;  %p2564_p11 = scmp.lt.s32.totalorder %s43_s28, %s43_s28 }
  0x1b   :  { %p2560_p10 = scmp.ne.s32.totalorder %s43_s28, %s2559_s7  ;;  %p2565_p12 = scmp.lt.s32.totalorder %s2559_s7, %s2559_s7 }
  0x1d   :  { %p2566_p13 = por %p2565_p12, %p2564_p11 }
  0x1f   :  { %p2567_p0 = pnand %p2566_p13, %p2560_p10 }
  0x21   :  { %2570 = shalt.err (!%p2567_p0)
}
  0x22   :  { %45 = dma.hbm_to_vmem [thread:$0]  %s2708_s2, 64, %s43_s28, [#allocation6]  }
  0x23   :  { %s2624_s9 = smov [#allocation8]  }
  0x24   :  { %s51_s10 = sshll.u32 %s2624_s9, 4  ;;  %s52_s10 = int_to_ptr.vmem [resolvable:$true] %s51_s10 }
  0x25   :  { %s2579_s11 = scalar_lea.vmem %s52_s10, 4096  ;;  %p2584_p2 = scmp.lt.s32.totalorder %s52_s10, %s52_s10 }
  0x26   :  { %p2580_p1 = scmp.ne.s32.totalorder %s52_s10, %s2579_s11  ;;  %p2585_p3 = scmp.lt.s32.totalorder %s2579_s11, %s2579_s11 }
  0x28   :  { %p2586_p4 = por %p2585_p3, %p2584_p2 }
  0x2a   :  { %p2587_p5 = pnand %p2586_p4, %p2580_p1 }
  0x2c   :  { %2590 = shalt.err (!%p2587_p5)
}
  0x2d   :  { %s2625_s0 = smov 64   ;;  %s2626_s12 = smov 4  }
  0x2e   :  { %57 = dma.hbm_to_vmem [thread:$0]  %s2709_s3, 4096, %s52_s10, [#allocation9], %s2625_s0, %s2625_s0, %s2626_s12  }
  0x2f   :  { %2611 = dma.done.wait [#allocation3], 384  }
  0x30   :  { %2612 = vsyncadd [#allocation3], 4294966912 }
  0x31   :  { %2613 = dma.done.wait [#allocation6], 24640  }
  0x32   :  { %2614 = vsyncadd [#allocation6], 4294942656 }
  0x33   :  { %2615 = dma.done.wait [#allocation9], 4096  }
  0x34   :  { %2616 = vsyncadd [#allocation9], 4294963200  ;;  %v2181_v0 = vld [vmem:[#allocation5 + $0xe4] ss:$16 sps:$4 sm:$0xff]   ;;  %v2185_v2 = vld [vmem:[#allocation5 + $0xe0] ss:$16 sps:$4 sm:$0xff]  }
  0x35   :  { %v2183_v1 = vld [vmem:[#allocation5 + $0x2e4] ss:$16 sps:$4 sm:$0xff]   ;;  %1271 = vmatprep.subr.bf16.mxu0 %v2181_v0  ;;  %v2186_v3 = vld [vmem:[#allocation5 + $0x2e0] ss:$16 sps:$4 sm:$0xff]   ;;  %v73_v46 = vld [vmem:[#allocation2] sm:$0xff]  ;;  %s2627_s15 = smov [#allocation10]  }
  0x36   :  { %1312 = vmatprep.subr.bf16.mxu1 %v2183_v1  ;;  %v2187_v4 = vld [vmem:[#allocation5 + $0xc4] ss:$16 sps:$4 sm:$0xff]   ;;  %1272 = vmatpush1.bf16.msra.mxu0 %v2185_v2  ;;  %v2191_v6 = vld [vmem:[#allocation5 + $0xc0] ss:$16 sps:$4 sm:$0xff]   ;;  %v2670_v47 = vcombine.high %v73_v46, %v73_v46 }
  0x37   :  { %1313 = vmatpush1.bf16.msra.mxu1 %v2186_v3  ;;  %v2189_v5 = vld [vmem:[#allocation5 + $0x2c4] ss:$16 sps:$4 sm:$0xff]   ;;  %1273 = vmatprep.subr.bf16.mxu0 %v2187_v4  ;;  %v2192_v7 = vld [vmem:[#allocation5 + $0x2c0] ss:$16 sps:$4 sm:$0xff]  }
  0x38   :  { %1314 = vmatprep.subr.bf16.mxu1 %v2189_v5  ;;  %v2193_v8 = vld [vmem:[#allocation5 + $0xa4] ss:$16 sps:$4 sm:$0xff]   ;;  %v2197_v10 = vld [vmem:[#allocation5 + $0xa0] ss:$16 sps:$4 sm:$0xff]   ;;  %1303 = vmatprep.mubr.bf16.mxu0 %v2670_v47  ;;  %v2286_v5 = vld [vmem:[#allocation5 + $0xec] ss:$16 sps:$4 sm:$0xff]  }
  0x39   :  { %v2195_v9 = vld [vmem:[#allocation5 + $0x2a4] ss:$16 sps:$4 sm:$0xff]   ;;  %v2198_v11 = vld [vmem:[#allocation5 + $0x2a0] ss:$16 sps:$4 sm:$0xff]  }
  0x3a   :  { %1274 = vmatpush1.bf16.msra.mxu0 %v2191_v6  ;;  %v2199_v12 = vld [vmem:[#allocation5 + $0x84] ss:$16 sps:$4 sm:$0xff]   ;;  %v2203_v14 = vld [vmem:[#allocation5 + $0x80] ss:$16 sps:$4 sm:$0xff]   ;;  %v2676_v6 = vcombine.low %v73_v46, %v73_v46 }
  0x3b   :  { %1315 = vmatpush1.bf16.msra.mxu1 %v2192_v7  ;;  %1275 = vmatprep.subr.bf16.mxu0 %v2193_v8  ;;  %v2201_v13 = vld [vmem:[#allocation5 + $0x284] ss:$16 sps:$4 sm:$0xff]   ;;  %v2204_v15 = vld [vmem:[#allocation5 + $0x280] ss:$16 sps:$4 sm:$0xff]  }
  0x3c   :  { %1316 = vmatprep.subr.bf16.mxu1 %v2195_v9  ;;  %v2205_v16 = vld [vmem:[#allocation5 + $0x64] ss:$16 sps:$4 sm:$0xff]   ;;  %v2209_v18 = vld [vmem:[#allocation5 + $0x60] ss:$16 sps:$4 sm:$0xff]   ;;  %v2284_v9 = vld [vmem:[#allocation5 + $0xe8] ss:$16 sps:$4 sm:$0xff]  }
  0x3d   :  { %v2207_v17 = vld [vmem:[#allocation5 + $0x264] ss:$16 sps:$4 sm:$0xff]   ;;  %v2210_v19 = vld [vmem:[#allocation5 + $0x260] ss:$16 sps:$4 sm:$0xff]  }
  0x3e   :  { %1276 = vmatpush1.bf16.msra.mxu0 %v2197_v10  ;;  %v2211_v20 = vld [vmem:[#allocation5 + $0x44] ss:$16 sps:$4 sm:$0xff]   ;;  %v2215_v22 = vld [vmem:[#allocation5 + $0x40] ss:$16 sps:$4 sm:$0xff]  }
  0x3f   :  { %1317 = vmatpush1.bf16.msra.mxu1 %v2198_v11  ;;  %1277 = vmatprep.subr.bf16.mxu0 %v2199_v12  ;;  %v2213_v21 = vld [vmem:[#allocation5 + $0x244] ss:$16 sps:$4 sm:$0xff]   ;;  %v2216_v23 = vld [vmem:[#allocation5 + $0x240] ss:$16 sps:$4 sm:$0xff]   ;;  %v2292_v11 = vld [vmem:[#allocation5 + $0xcc] ss:$16 sps:$4 sm:$0xff]  }
  0x40   :  { %1318 = vmatprep.subr.bf16.mxu1 %v2201_v13  ;;  %v2217_v24 = vld [vmem:[#allocation5 + $0x24] ss:$16 sps:$4 sm:$0xff]   ;;  %v2221_v26 = vld [vmem:[#allocation5 + $0x20] ss:$16 sps:$4 sm:$0xff]   ;;  %v2290_v13 = vld [vmem:[#allocation5 + $0xc8] ss:$16 sps:$4 sm:$0xff]  }
  0x41   :  { %v2219_v25 = vld [vmem:[#allocation5 + $0x224] ss:$16 sps:$4 sm:$0xff]   ;;  %v2222_v27 = vld [vmem:[#allocation5 + $0x220] ss:$16 sps:$4 sm:$0xff]  }
  0x42   :  { %1278 = vmatpush1.bf16.msra.mxu0 %v2203_v14  ;;  %v2223_v28 = vld [vmem:[#allocation5 + $0x4] ss:$16 sps:$4 sm:$0xff]   ;;  %v2227_v30 = vld [vmem:[#allocation5] ss:$16 sps:$4 sm:$0xff]  }
  0x43   :  { %1319 = vmatpush1.bf16.msra.mxu1 %v2204_v15  ;;  %1279 = vmatprep.subr.bf16.mxu0 %v2205_v16  ;;  %v2225_v29 = vld [vmem:[#allocation5 + $0x204] ss:$16 sps:$4 sm:$0xff]   ;;  %v2228_v31 = vld [vmem:[#allocation5 + $0x200] ss:$16 sps:$4 sm:$0xff]   ;;  %v2298_v15 = vld [vmem:[#allocation5 + $0xac] ss:$16 sps:$4 sm:$0xff]  }
  0x44   :  { %1320 = vmatprep.subr.bf16.mxu1 %v2207_v17  ;;  %v2229_v32 = vld [vmem:[#allocation5 + $0x1e4] ss:$16 sps:$4 sm:$0xff]   ;;  %v2233_v34 = vld [vmem:[#allocation5 + $0x1e0] ss:$16 sps:$4 sm:$0xff]   ;;  %v2296_v17 = vld [vmem:[#allocation5 + $0xa8] ss:$16 sps:$4 sm:$0xff]  }
  0x45   :  { %v2231_v33 = vld [vmem:[#allocation5 + $0x3e4] ss:$16 sps:$4 sm:$0xff]   ;;  %v2234_v35 = vld [vmem:[#allocation5 + $0x3e0] ss:$16 sps:$4 sm:$0xff]  }
  0x46   :  { %1280 = vmatpush1.bf16.msra.mxu0 %v2209_v18  ;;  %v2235_v36 = vld [vmem:[#allocation5 + $0x1c4] ss:$16 sps:$4 sm:$0xff]   ;;  %v2239_v38 = vld [vmem:[#allocation5 + $0x1c0] ss:$16 sps:$4 sm:$0xff]  }
  0x47   :  { %1321 = vmatpush1.bf16.msra.mxu1 %v2210_v19  ;;  %1281 = vmatprep.subr.bf16.mxu0 %v2211_v20  ;;  %v2237_v37 = vld [vmem:[#allocation5 + $0x3c4] ss:$16 sps:$4 sm:$0xff]   ;;  %v2240_v39 = vld [vmem:[#allocation5 + $0x3c0] ss:$16 sps:$4 sm:$0xff]   ;;  %v2304_v19 = vld [vmem:[#allocation5 + $0x8c] ss:$16 sps:$4 sm:$0xff]  }
  0x48   :  { %1322 = vmatprep.subr.bf16.mxu1 %v2213_v21  ;;  %v2241_v40 = vld [vmem:[#allocation5 + $0x1a4] ss:$16 sps:$4 sm:$0xff]   ;;  %v2245_v42 = vld [vmem:[#allocation5 + $0x1a0] ss:$16 sps:$4 sm:$0xff]   ;;  %v2302_v21 = vld [vmem:[#allocation5 + $0x88] ss:$16 sps:$4 sm:$0xff]  }
  0x49   :  { %v2243_v41 = vld [vmem:[#allocation5 + $0x3a4] ss:$16 sps:$4 sm:$0xff]   ;;  %v2246_v43 = vld [vmem:[#allocation5 + $0x3a0] ss:$16 sps:$4 sm:$0xff]  }
  0x4a   :  { %1282 = vmatpush1.bf16.msra.mxu0 %v2215_v22  ;;  %v2247_v44 = vld [vmem:[#allocation5 + $0x184] ss:$16 sps:$4 sm:$0xff]   ;;  %v2251_v49 = vld [vmem:[#allocation5 + $0x180] ss:$16 sps:$4 sm:$0xff]  }
  0x4b   :  { %1323 = vmatpush1.bf16.msra.mxu1 %v2216_v23  ;;  %1283 = vmatprep.subr.bf16.mxu0 %v2217_v24  ;;  %v2249_v45 = vld [vmem:[#allocation5 + $0x384] ss:$16 sps:$4 sm:$0xff]   ;;  %v2252_v50 = vld [vmem:[#allocation5 + $0x380] ss:$16 sps:$4 sm:$0xff]   ;;  %v2310_v23 = vld [vmem:[#allocation5 + $0x6c] ss:$16 sps:$4 sm:$0xff]  }
  0x4c   :  { %1324 = vmatprep.subr.bf16.mxu1 %v2219_v25  ;;  %v74_v48 = vld [vmem:[#allocation2 + $0x8] sm:$0xff]  ;;  %v2308_v25 = vld [vmem:[#allocation5 + $0x68] ss:$16 sps:$4 sm:$0xff]  }
  0x4d   :  { %v2672_v51 = vcombine.high %v74_v48, %v74_v48  ;;  %v2253_v52 = vld [vmem:[#allocation5 + $0x164] ss:$16 sps:$4 sm:$0xff]   ;;  %v2257_v54 = vld [vmem:[#allocation5 + $0x160] ss:$16 sps:$4 sm:$0xff]   ;;  %v2678_v7 = vcombine.low %v74_v48, %v74_v48 }
  0x4e   :  { %1284 = vmatpush1.bf16.msra.mxu0 %v2221_v26  ;;  %v2255_v53 = vld [vmem:[#allocation5 + $0x364] ss:$16 sps:$4 sm:$0xff]   ;;  %v2258_v55 = vld [vmem:[#allocation5 + $0x360] ss:$16 sps:$4 sm:$0xff]  }
  0x4f   :  { %1325 = vmatpush1.bf16.msra.mxu1 %v2222_v27  ;;  %1285 = vmatprep.subr.bf16.mxu0 %v2223_v28  ;;  %v2259_v56 = vld [vmem:[#allocation5 + $0x144] ss:$16 sps:$4 sm:$0xff]   ;;  %v2263_v58 = vld [vmem:[#allocation5 + $0x140] ss:$16 sps:$4 sm:$0xff]   ;;  %v2316_v27 = vld [vmem:[#allocation5 + $0x4c] ss:$16 sps:$4 sm:$0xff]  }
  0x50   :  { %1326 = vmatprep.subr.bf16.mxu1 %v2225_v29  ;;  %1344 = vmatprep.mubr.bf16.mxu1 %v2672_v51  ;;  %v2261_v57 = vld [vmem:[#allocation5 + $0x344] ss:$16 sps:$4 sm:$0xff]   ;;  %v2264_v59 = vld [vmem:[#allocation5 + $0x340] ss:$16 sps:$4 sm:$0xff]   ;;  %v2314_v29 = vld [vmem:[#allocation5 + $0x48] ss:$16 sps:$4 sm:$0xff]  }
  0x51   :  { %v2265_v60 = vld [vmem:[#allocation5 + $0x124] ss:$16 sps:$4 sm:$0xff]   ;;  %v2269_v62 = vld [vmem:[#allocation5 + $0x120] ss:$16 sps:$4 sm:$0xff]  }
  0x52   :  { %1286 = vmatpush1.bf16.msra.mxu0 %v2227_v30  ;;  %v2267_v61 = vld [vmem:[#allocation5 + $0x324] ss:$16 sps:$4 sm:$0xff]   ;;  %v2270_v63 = vld [vmem:[#allocation5 + $0x320] ss:$16 sps:$4 sm:$0xff]  }
  0x53   :  { %1327 = vmatpush1.bf16.msra.mxu1 %v2228_v31  ;;  %1287 = vmatprep.subr.bf16.mxu0 %v2229_v32  ;;  %v2271_v0 = vld [vmem:[#allocation5 + $0x104] ss:$16 sps:$4 sm:$0xff]   ;;  %v2275_v2 = vld [vmem:[#allocation5 + $0x100] ss:$16 sps:$4 sm:$0xff]   ;;  %v2322_v31 = vld [vmem:[#allocation5 + $0x2c] ss:$16 sps:$4 sm:$0xff]  }
  0x54   :  { %1328 = vmatprep.subr.bf16.mxu1 %v2231_v33  ;;  %v2273_v1 = vld [vmem:[#allocation5 + $0x304] ss:$16 sps:$4 sm:$0xff]   ;;  %v2276_v3 = vld [vmem:[#allocation5 + $0x300] ss:$16 sps:$4 sm:$0xff]   ;;  %v2683_v32 = vld [vmem:[#allocation2 + $0x10] sm:$0xff] }
  0x55   :  { %v2283_v4 = vld [vmem:[#allocation5 + $0x4e4] ss:$16 sps:$4 sm:$0xff]   ;;  %v2281_v8 = vld [vmem:[#allocation5 + $0x4e0] ss:$16 sps:$4 sm:$0xff]  }
  0x56   :  { %1288 = vmatpush2.bf16.msra.mxu0 %v2233_v34  ;;  %v2289_v10 = vld [vmem:[#allocation5 + $0x4c4] ss:$16 sps:$4 sm:$0xff]   ;;  %v2287_v12 = vld [vmem:[#allocation5 + $0x4c0] ss:$16 sps:$4 sm:$0xff]   ;;  %v2687_v34 = vcombine.high %v2683_v32, %v2683_v32 }
  0x57   :  { %1329 = vmatpush2.bf16.msra.mxu1 %v2234_v35  ;;  %1289 = vmatprep.subr.bf16.mxu0 %v2235_v36  ;;  %v2295_v14 = vld [vmem:[#allocation5 + $0x4a4] ss:$16 sps:$4 sm:$0xff]   ;;  %v2293_v16 = vld [vmem:[#allocation5 + $0x4a0] ss:$16 sps:$4 sm:$0xff]   ;;  %v2320_v35 = vld [vmem:[#allocation5 + $0x28] ss:$16 sps:$4 sm:$0xff]  }
  0x58   :  { %1330 = vmatprep.subr.bf16.mxu1 %v2237_v37  ;;  %v2301_v18 = vld [vmem:[#allocation5 + $0x484] ss:$16 sps:$4 sm:$0xff]   ;;  %v2299_v20 = vld [vmem:[#allocation5 + $0x480] ss:$16 sps:$4 sm:$0xff]   ;;  %v2328_v37 = vld [vmem:[#allocation5 + $0xc] ss:$16 sps:$4 sm:$0xff]  }
  0x59   :  { %v2307_v22 = vld [vmem:[#allocation5 + $0x464] ss:$16 sps:$4 sm:$0xff]   ;;  %v2305_v24 = vld [vmem:[#allocation5 + $0x460] ss:$16 sps:$4 sm:$0xff]  }
  0x5a   :  { %1290 = vmatpush2.bf16.msra.mxu0 %v2239_v38  ;;  %v2313_v26 = vld [vmem:[#allocation5 + $0x444] ss:$16 sps:$4 sm:$0xff]   ;;  %v2311_v28 = vld [vmem:[#allocation5 + $0x440] ss:$16 sps:$4 sm:$0xff]  }
  0x5b   :  { %1331 = vmatpush2.bf16.msra.mxu1 %v2240_v39  ;;  %1291 = vmatprep.subr.bf16.mxu0 %v2241_v40  ;;  %v2319_v30 = vld [vmem:[#allocation5 + $0x424] ss:$16 sps:$4 sm:$0xff]   ;;  %v2317_v33 = vld [vmem:[#allocation5 + $0x420] ss:$16 sps:$4 sm:$0xff]   ;;  %v2326_v39 = vld [vmem:[#allocation5 + $0x8] ss:$16 sps:$4 sm:$0xff]  }
  0x5c   :  { %1332 = vmatprep.subr.bf16.mxu1 %v2243_v41  ;;  %v2325_v36 = vld [vmem:[#allocation5 + $0x404] ss:$16 sps:$4 sm:$0xff]   ;;  %v2323_v38 = vld [vmem:[#allocation5 + $0x400] ss:$16 sps:$4 sm:$0xff]   ;;  %v2334_v41 = vld [vmem:[#allocation5 + $0x1ec] ss:$16 sps:$4 sm:$0xff]  }
  0x5d   :  { %v2331_v40 = vld [vmem:[#allocation5 + $0x5e4] ss:$16 sps:$4 sm:$0xff]   ;;  %v2335_v46 = vld [vmem:[#allocation5 + $0x5c0] ss:$16 sps:$4 sm:$0xff]  }
  0x5e   :  { %1292 = vmatpush2.bf16.msra.mxu0 %v2245_v42  ;;  %v2329_v42 = vld [vmem:[#allocation5 + $0x5e0] ss:$16 sps:$4 sm:$0xff]   ;;  %v2343_v48 = vld [vmem:[#allocation5 + $0x5a4] ss:$16 sps:$4 sm:$0xff]  }
  0x5f   :  { %1333 = vmatpush2.bf16.msra.mxu1 %v2246_v43  ;;  %1293 = vmatprep.subr.bf16.mxu0 %v2247_v44  ;;  %v2332_v43 = vld [vmem:[#allocation5 + $0x1e8] ss:$16 sps:$4 sm:$0xff]   ;;  %v2337_v44 = vld [vmem:[#allocation5 + $0x5c4] ss:$16 sps:$4 sm:$0xff]  }
  0x60   :  { %1334 = vmatprep.subr.bf16.mxu1 %v2249_v45  ;;  %v2340_v45 = vld [vmem:[#allocation5 + $0x1cc] ss:$16 sps:$4 sm:$0xff]  }
  0x62   :  { %1294 = vmatpush2.bf16.msra.mxu0 %v2251_v49  ;;  %v2346_v49 = vld [vmem:[#allocation5 + $0x1ac] ss:$16 sps:$4 sm:$0xff]  }
  0x63   :  { %1335 = vmatpush2.bf16.msra.mxu1 %v2252_v50  ;;  %1295 = vmatprep.subr.bf16.mxu0 %v2253_v52  ;;  %v2341_v50 = vld [vmem:[#allocation5 + $0x5a0] ss:$16 sps:$4 sm:$0xff]   ;;  %v2344_v52 = vld [vmem:[#allocation5 + $0x1a8] ss:$16 sps:$4 sm:$0xff]  }
  0x64   :  { %1336 = vmatprep.subr.bf16.mxu1 %v2255_v53  ;;  %v2349_v53 = vld [vmem:[#allocation5 + $0x584] ss:$16 sps:$4 sm:$0xff]  }
  0x66   :  { %1296 = vmatpush2.bf16.msra.mxu0 %v2257_v54  ;;  %v2352_v54 = vld [vmem:[#allocation5 + $0x18c] ss:$16 sps:$4 sm:$0xff]  }
  0x67   :  { %1337 = vmatpush2.bf16.msra.mxu1 %v2258_v55  ;;  %1297 = vmatprep.subr.bf16.mxu0 %v2259_v56  ;;  %v2347_v55 = vld [vmem:[#allocation5 + $0x580] ss:$16 sps:$4 sm:$0xff]   ;;  %v2350_v56 = vld [vmem:[#allocation5 + $0x188] ss:$16 sps:$4 sm:$0xff]  }
  0x68   :  { %1338 = vmatprep.subr.bf16.mxu1 %v2261_v57  ;;  %v2355_v57 = vld [vmem:[#allocation5 + $0x564] ss:$16 sps:$4 sm:$0xff]  }
  0x6a   :  { %1298 = vmatpush2.bf16.msra.mxu0 %v2263_v58  ;;  %v2358_v58 = vld [vmem:[#allocation5 + $0x16c] ss:$16 sps:$4 sm:$0xff]  }
  0x6b   :  { %1339 = vmatpush2.bf16.msra.mxu1 %v2264_v59  ;;  %1299 = vmatprep.subr.bf16.mxu0 %v2265_v60  ;;  %v2353_v59 = vld [vmem:[#allocation5 + $0x560] ss:$16 sps:$4 sm:$0xff]   ;;  %v2356_v60 = vld [vmem:[#allocation5 + $0x168] ss:$16 sps:$4 sm:$0xff]  }
  0x6c   :  { %1340 = vmatprep.subr.bf16.mxu1 %v2267_v61  ;;  %v2361_v61 = vld [vmem:[#allocation5 + $0x544] ss:$16 sps:$4 sm:$0xff]  }
  0x6e   :  { %1300 = vmatpush2.bf16.msra.mxu0 %v2269_v62  ;;  %v2364_v62 = vld [vmem:[#allocation5 + $0x14c] ss:$16 sps:$4 sm:$0xff]  }
  0x6f   :  { %1341 = vmatpush2.bf16.msra.mxu1 %v2270_v63  ;;  %1301 = vmatprep.subr.bf16.mxu0 %v2271_v0  ;;  %v2359_v63 = vld [vmem:[#allocation5 + $0x540] ss:$16 sps:$4 sm:$0xff]   ;;  %v2362_v0 = vld [vmem:[#allocation5 + $0x148] ss:$16 sps:$4 sm:$0xff]  }
  0x70   :  { %1342 = vmatprep.subr.bf16.mxu1 %v2273_v1  ;;  %v2367_v1 = vld [vmem:[#allocation5 + $0x524] ss:$16 sps:$4 sm:$0xff]  }
  0x72   :  { %1302 = vmatpush2.bf16.msra.mxu0 %v2275_v2  ;;  %v2370_v2 = vld [vmem:[#allocation5 + $0x12c] ss:$16 sps:$4 sm:$0xff]  }
  0x73   :  { %1343 = vmatpush2.bf16.msra.mxu1 %v2276_v3  ;;  %1353 = vmatprep.subr.bf16.mxu0 %v2283_v4  ;;  %v2365_v3 = vld [vmem:[#allocation5 + $0x520] ss:$16 sps:$4 sm:$0xff]   ;;  %v2368_v4 = vld [vmem:[#allocation5 + $0x128] ss:$16 sps:$4 sm:$0xff]  }
  0x74   :  { %1394 = vmatprep.subr.bf16.mxu1 %v2286_v5  ;;  %v2373_v5 = vld [vmem:[#allocation5 + $0x504] ss:$16 sps:$4 sm:$0xff]  }
  0x75   :  { %1304 = vmatmul.mubr.bf16.vlgmr.msra.gmra.mxu0 %v2676_v6 }
  0x76   :  { %1345 = vmatmul.mubr.bf16.vlgmr.msra.gmra.mxu1 %v2678_v7  ;;  %1354 = vmatpush1.bf16.msra.mxu0 %v2281_v8  ;;  %v2376_v8 = vld [vmem:[#allocation5 + $0x10c] ss:$16 sps:$4 sm:$0xff]  }
  0x77   :  { %1395 = vmatpush1.bf16.msra.mxu1 %v2284_v9  ;;  %1355 = vmatprep.subr.bf16.mxu0 %v2289_v10  ;;  %v2371_v9 = vld [vmem:[#allocation5 + $0x500] ss:$16 sps:$4 sm:$0xff]   ;;  %v2374_v10 = vld [vmem:[#allocation5 + $0x108] ss:$16 sps:$4 sm:$0xff]  }
  0x78   :  { %1396 = vmatprep.subr.bf16.mxu1 %v2292_v11  ;;  %1426 = vmatprep.mubr.bf16.mxu1 %v2670_v47  ;;  %v2338_v47 = vld [vmem:[#allocation5 + $0x1c8] ss:$16 sps:$4 sm:$0xff]   ;;  %v2381_v11 = vld [vmem:[#allocation5 + $0x2ec] ss:$16 sps:$4 sm:$0xff]  }
  0x79   :  { %1385 = vmatprep.mubr.bf16.mxu0 %v2687_v34 }
  0x7a   :  { %1356 = vmatpush1.bf16.msra.mxu0 %v2287_v12  ;;  %v2384_v12 = vld [vmem:[#allocation5 + $0x4ec] ss:$16 sps:$4 sm:$0xff]  }
  0x7b   :  { %1397 = vmatpush1.bf16.msra.mxu1 %v2290_v13  ;;  %1357 = vmatprep.subr.bf16.mxu0 %v2295_v14  ;;  %v2692_v13 = vcombine.low %v2683_v32, %v2683_v32  ;;  %v2379_v14 = vld [vmem:[#allocation5 + $0x2e8] ss:$16 sps:$4 sm:$0xff]  }
  0x7c   :  { %1398 = vmatprep.subr.bf16.mxu1 %v2298_v15  ;;  %v2382_v15 = vld [vmem:[#allocation5 + $0x4e8] ss:$16 sps:$4 sm:$0xff]  }
  0x7d   :  { %v2409_v32 = vld [vmem:[#allocation5 + $0x248] ss:$16 sps:$4 sm:$0xff]  }
  0x7e   :  { %1358 = vmatpush1.bf16.msra.mxu0 %v2293_v16  ;;  %v2387_v16 = vld [vmem:[#allocation5 + $0x2cc] ss:$16 sps:$4 sm:$0xff]  }
  0x7f   :  { %1399 = vmatpush1.bf16.msra.mxu1 %v2296_v17  ;;  %1359 = vmatprep.subr.bf16.mxu0 %v2301_v18  ;;  %v2390_v17 = vld [vmem:[#allocation5 + $0x4cc] ss:$16 sps:$4 sm:$0xff]   ;;  %v2385_v18 = vld [vmem:[#allocation5 + $0x2c8] ss:$16 sps:$4 sm:$0xff]  }
  0x80   :  { %1400 = vmatprep.subr.bf16.mxu1 %v2304_v19  ;;  %v2388_v19 = vld [vmem:[#allocation5 + $0x4c8] ss:$16 sps:$4 sm:$0xff]  }
  0x82   :  { %1360 = vmatpush1.bf16.msra.mxu0 %v2299_v20  ;;  %v2393_v20 = vld [vmem:[#allocation5 + $0x2ac] ss:$16 sps:$4 sm:$0xff]  }
  0x83   :  { %1401 = vmatpush1.bf16.msra.mxu1 %v2302_v21  ;;  %1361 = vmatprep.subr.bf16.mxu0 %v2307_v22  ;;  %v2396_v21 = vld [vmem:[#allocation5 + $0x4ac] ss:$16 sps:$4 sm:$0xff]   ;;  %v2391_v22 = vld [vmem:[#allocation5 + $0x2a8] ss:$16 sps:$4 sm:$0xff]  }
  0x84   :  { %1402 = vmatprep.subr.bf16.mxu1 %v2310_v23  ;;  %v2394_v23 = vld [vmem:[#allocation5 + $0x4a8] ss:$16 sps:$4 sm:$0xff]  }
  0x86   :  { %1362 = vmatpush1.bf16.msra.mxu0 %v2305_v24  ;;  %v2399_v24 = vld [vmem:[#allocation5 + $0x28c] ss:$16 sps:$4 sm:$0xff]  }
  0x87   :  { %1403 = vmatpush1.bf16.msra.mxu1 %v2308_v25  ;;  %1363 = vmatprep.subr.bf16.mxu0 %v2313_v26  ;;  %v2402_v25 = vld [vmem:[#allocation5 + $0x48c] ss:$16 sps:$4 sm:$0xff]   ;;  %v2397_v26 = vld [vmem:[#allocation5 + $0x288] ss:$16 sps:$4 sm:$0xff]  }
  0x88   :  { %1404 = vmatprep.subr.bf16.mxu1 %v2316_v27  ;;  %v2405_v27 = vld [vmem:[#allocation5 + $0x26c] ss:$16 sps:$4 sm:$0xff]  }
  0x8a   :  { %1364 = vmatpush1.bf16.msra.mxu0 %v2311_v28  ;;  %v2408_v28 = vld [vmem:[#allocation5 + $0x46c] ss:$16 sps:$4 sm:$0xff]  }
  0x8b   :  { %1405 = vmatpush1.bf16.msra.mxu1 %v2314_v29  ;;  %1365 = vmatprep.subr.bf16.mxu0 %v2319_v30  ;;  %v2403_v29 = vld [vmem:[#allocation5 + $0x268] ss:$16 sps:$4 sm:$0xff]  }
  0x8c   :  { %1406 = vmatprep.subr.bf16.mxu1 %v2322_v31  ;;  %v2406_v30 = vld [vmem:[#allocation5 + $0x468] ss:$16 sps:$4 sm:$0xff]   ;;  %v2411_v31 = vld [vmem:[#allocation5 + $0x24c] ss:$16 sps:$4 sm:$0xff]  }
  0x8e   :  { %1366 = vmatpush1.bf16.msra.mxu0 %v2317_v33  ;;  %v2412_v33 = vld [vmem:[#allocation5 + $0x448] ss:$16 sps:$4 sm:$0xff]  }
  0x8f   :  { %1407 = vmatpush1.bf16.msra.mxu1 %v2320_v35  ;;  %1367 = vmatprep.subr.bf16.mxu0 %v2325_v36  ;;  %v2420_v35 = vld [vmem:[#allocation5 + $0x42c] ss:$16 sps:$4 sm:$0xff]   ;;  %v2415_v36 = vld [vmem:[#allocation5 + $0x228] ss:$16 sps:$4 sm:$0xff]  }
  0x90   :  { %1408 = vmatprep.subr.bf16.mxu1 %v2328_v37  ;;  %v2418_v37 = vld [vmem:[#allocation5 + $0x428] ss:$16 sps:$4 sm:$0xff]  }
  0x92   :  { %1368 = vmatpush1.bf16.msra.mxu0 %v2323_v38  ;;  %v2423_v38 = vld [vmem:[#allocation5 + $0x20c] ss:$16 sps:$4 sm:$0xff]  }
  0x93   :  { %1409 = vmatpush1.bf16.msra.mxu1 %v2326_v39  ;;  %1369 = vmatprep.subr.bf16.mxu0 %v2331_v40  ;;  %v2426_v39 = vld [vmem:[#allocation5 + $0x40c] ss:$16 sps:$4 sm:$0xff]   ;;  %v2421_v40 = vld [vmem:[#allocation5 + $0x208] ss:$16 sps:$4 sm:$0xff]  }
  0x94   :  { %1410 = vmatprep.subr.bf16.mxu1 %v2334_v41  ;;  %v2424_v41 = vld [vmem:[#allocation5 + $0x408] ss:$16 sps:$4 sm:$0xff]  }
  0x96   :  { %1370 = vmatpush2.bf16.msra.mxu0 %v2329_v42  ;;  %v2429_v42 = vld [vmem:[#allocation5 + $0x3ec] ss:$16 sps:$4 sm:$0xff]  }
  0x97   :  { %1411 = vmatpush2.bf16.msra.mxu1 %v2332_v43  ;;  %1371 = vmatprep.subr.bf16.mxu0 %v2337_v44  ;;  %v2432_v43 = vld [vmem:[#allocation5 + $0x5ec] ss:$16 sps:$4 sm:$0xff]   ;;  %v2427_v44 = vld [vmem:[#allocation5 + $0x3e8] ss:$16 sps:$4 sm:$0xff]  }
  0x98   :  { %1412 = vmatprep.subr.bf16.mxu1 %v2340_v45  ;;  %v2430_v45 = vld [vmem:[#allocation5 + $0x5e8] ss:$16 sps:$4 sm:$0xff]  }
  0x9a   :  { %1372 = vmatpush2.bf16.msra.mxu0 %v2335_v46  ;;  %v2435_v46 = vld [vmem:[#allocation5 + $0x3cc] ss:$16 sps:$4 sm:$0xff]  }
  0x9b   :  { %1413 = vmatpush2.bf16.msra.mxu1 %v2338_v47  ;;  %1373 = vmatprep.subr.bf16.mxu0 %v2343_v48  ;;  %v2438_v47 = vld [vmem:[#allocation5 + $0x5cc] ss:$16 sps:$4 sm:$0xff]   ;;  %v2433_v48 = vld [vmem:[#allocation5 + $0x3c8] ss:$16 sps:$4 sm:$0xff]  }
  0x9c   :  { %1414 = vmatprep.subr.bf16.mxu1 %v2346_v49  ;;  %v2436_v49 = vld [vmem:[#allocation5 + $0x5c8] ss:$16 sps:$4 sm:$0xff]  }
  0x9e   :  { %1374 = vmatpush2.bf16.msra.mxu0 %v2341_v50  ;;  %v2441_v50 = vld [vmem:[#allocation5 + $0x3ac] ss:$16 sps:$4 sm:$0xff]  }
  0x9f   :  { %1415 = vmatpush2.bf16.msra.mxu1 %v2344_v52  ;;  %1375 = vmatprep.subr.bf16.mxu0 %v2349_v53  ;;  %v2444_v52 = vld [vmem:[#allocation5 + $0x5ac] ss:$16 sps:$4 sm:$0xff]   ;;  %v2439_v53 = vld [vmem:[#allocation5 + $0x3a8] ss:$16 sps:$4 sm:$0xff]  }
  0xa0   :  { %1416 = vmatprep.subr.bf16.mxu1 %v2352_v54  ;;  %v2442_v54 = vld [vmem:[#allocation5 + $0x5a8] ss:$16 sps:$4 sm:$0xff]  }
  0xa2   :  { %1376 = vmatpush2.bf16.msra.mxu0 %v2347_v55  ;;  %v2447_v55 = vld [vmem:[#allocation5 + $0x38c] ss:$16 sps:$4 sm:$0xff]  }
  0xa3   :  { %1417 = vmatpush2.bf16.msra.mxu1 %v2350_v56  ;;  %1377 = vmatprep.subr.bf16.mxu0 %v2355_v57  ;;  %v2450_v56 = vld [vmem:[#allocation5 + $0x58c] ss:$16 sps:$4 sm:$0xff]   ;;  %v2445_v57 = vld [vmem:[#allocation5 + $0x388] ss:$16 sps:$4 sm:$0xff]  }
  0xa4   :  { %1418 = vmatprep.subr.bf16.mxu1 %v2358_v58  ;;  %v2448_v58 = vld [vmem:[#allocation5 + $0x588] ss:$16 sps:$4 sm:$0xff]  }
  0xa6   :  { %1378 = vmatpush2.bf16.msra.mxu0 %v2353_v59  ;;  %v2453_v59 = vld [vmem:[#allocation5 + $0x36c] ss:$16 sps:$4 sm:$0xff]  }
  0xa7   :  { %1419 = vmatpush2.bf16.msra.mxu1 %v2356_v60  ;;  %1379 = vmatprep.subr.bf16.mxu0 %v2361_v61  ;;  %v2456_v60 = vld [vmem:[#allocation5 + $0x56c] ss:$16 sps:$4 sm:$0xff]   ;;  %v2451_v61 = vld [vmem:[#allocation5 + $0x368] ss:$16 sps:$4 sm:$0xff]  }
  0xa8   :  { %1420 = vmatprep.subr.bf16.mxu1 %v2364_v62  ;;  %v2454_v62 = vld [vmem:[#allocation5 + $0x568] ss:$16 sps:$4 sm:$0xff]  }
  0xaa   :  { %1380 = vmatpush2.bf16.msra.mxu0 %v2359_v63  ;;  %v2459_v63 = vld [vmem:[#allocation5 + $0x34c] ss:$16 sps:$4 sm:$0xff]  }
  0xab   :  { %1421 = vmatpush2.bf16.msra.mxu1 %v2362_v0  ;;  %1381 = vmatprep.subr.bf16.mxu0 %v2367_v1  ;;  %v2462_v0 = vld [vmem:[#allocation5 + $0x54c] ss:$16 sps:$4 sm:$0xff]   ;;  %v2457_v1 = vld [vmem:[#allocation5 + $0x348] ss:$16 sps:$4 sm:$0xff]  }
  0xac   :  { %1422 = vmatprep.subr.bf16.mxu1 %v2370_v2  ;;  %v2460_v2 = vld [vmem:[#allocation5 + $0x548] ss:$16 sps:$4 sm:$0xff]  }
  0xae   :  { %1382 = vmatpush2.bf16.msra.mxu0 %v2365_v3  ;;  %v2465_v3 = vld [vmem:[#allocation5 + $0x32c] ss:$16 sps:$4 sm:$0xff]  }
  0xaf   :  { %1423 = vmatpush2.bf16.msra.mxu1 %v2368_v4  ;;  %1383 = vmatprep.subr.bf16.mxu0 %v2373_v5  ;;  %v2468_v4 = vld [vmem:[#allocation5 + $0x52c] ss:$16 sps:$4 sm:$0xff]   ;;  %v2463_v5 = vld [vmem:[#allocation5 + $0x328] ss:$16 sps:$4 sm:$0xff]  }
  0xb0   :  { %1424 = vmatprep.subr.bf16.mxu1 %v2376_v8  ;;  %v2466_v8 = vld [vmem:[#allocation5 + $0x528] ss:$16 sps:$4 sm:$0xff]  }
  0xb2   :  { %1384 = vmatpush2.bf16.msra.mxu0 %v2371_v9  ;;  %v2471_v9 = vld [vmem:[#allocation5 + $0x30c] ss:$16 sps:$4 sm:$0xff]  }
  0xb3   :  { %1425 = vmatpush2.bf16.msra.mxu1 %v2374_v10  ;;  %1435 = vmatprep.subr.bf16.mxu0 %v2381_v11  ;;  %v2474_v10 = vld [vmem:[#allocation5 + $0x50c] ss:$16 sps:$4 sm:$0xff]   ;;  %v2469_v11 = vld [vmem:[#allocation5 + $0x308] ss:$16 sps:$4 sm:$0xff]  }
  0xb4   :  { %1476 = vmatprep.subr.bf16.mxu1 %v2384_v12  ;;  %v2472_v12 = vld [vmem:[#allocation5 + $0x508] ss:$16 sps:$4 sm:$0xff]  }
  0xb5   :  { %1386 = vmatmul.mubr.bf16.vlgmr.msra.gmra.mxu0 %v2692_v13 }
  0xb6   :  { %1427 = vmatmul.mubr.bf16.vlgmr.msra.gmra.mxu1 %v2676_v6  ;;  %1436 = vmatpush1.bf16.msra.mxu0 %v2379_v14  ;;  %v2400_v6 = vld [vmem:[#allocation5 + $0x488] ss:$16 sps:$4 sm:$0xff]   ;;  %v2475_v14 = vld [vmem:[#allocation8 + $0x78] sm:$0xff]  }
  0xb7   :  { %1477 = vmatpush1.bf16.msra.mxu1 %v2382_v15  ;;  %1437 = vmatprep.subr.bf16.mxu0 %v2387_v16  ;;  %v2476_v15 = vld [vmem:[#allocation8 + $0x38] sm:$0xff]   ;;  %v2477_v16 = vld [vmem:[#allocation8 + $0x70] sm:$0xff]  }
  0xb8   :  { %1478 = vmatprep.subr.bf16.mxu1 %v2390_v17  ;;  %1467 = vmatprep.mubr.bf16.mxu0 %v2672_v51  ;;  %v2414_v51 = vld [vmem:[#allocation5 + $0x44c] ss:$16 sps:$4 sm:$0xff]   ;;  %v2478_v17 = vld [vmem:[#allocation8 + $0x30] sm:$0xff]  }
  0xb9   :  { %1508 = vmatprep.mubr.bf16.mxu1 %v2687_v34  ;;  %v2417_v34 = vld [vmem:[#allocation5 + $0x22c] ss:$16 sps:$4 sm:$0xff]  }
  0xba   :  { %1438 = vmatpush1.bf16.msra.mxu0 %v2385_v18  ;;  %v2479_v18 = vld [vmem:[#allocation8 + $0x68] sm:$0xff]  }
  0xbb   :  { %1479 = vmatpush1.bf16.msra.mxu1 %v2388_v19  ;;  %1439 = vmatprep.subr.bf16.mxu0 %v2393_v20  ;;  %v2480_v19 = vld [vmem:[#allocation8 + $0x28] sm:$0xff]   ;;  %v2481_v20 = vld [vmem:[#allocation8 + $0x60] sm:$0xff]  }
  0xbc   :  { %1480 = vmatprep.subr.bf16.mxu1 %v2396_v21  ;;  %v2482_v21 = vld [vmem:[#allocation8 + $0x20] sm:$0xff]  }
  0xbe   :  { %1440 = vmatpush1.bf16.msra.mxu0 %v2391_v22  ;;  %v2483_v22 = vld [vmem:[#allocation8 + $0x58] sm:$0xff]  }
  0xbf   :  { %1481 = vmatpush1.bf16.msra.mxu1 %v2394_v23  ;;  %1441 = vmatprep.subr.bf16.mxu0 %v2399_v24  ;;  %v2491_v23 = vld [vmem:[#allocation8 + $0xf8] sm:$0xff]  }
  0xc0   :  { %1482 = vmatprep.subr.bf16.mxu1 %v2402_v25  ;;  %v2492_v24 = vld [vmem:[#allocation8 + $0xb8] sm:$0xff]   ;;  %v2493_v25 = vld [vmem:[#allocation8 + $0xf0] sm:$0xff]  }
  0xc2   :  { %1442 = vmatpush1.bf16.msra.mxu0 %v2397_v26  ;;  %v2485_v26 = vld [vmem:[#allocation8 + $0x50] sm:$0xff]  }
  0xc3   :  { %1483 = vmatpush1.bf16.msra.mxu1 %v2400_v6  ;;  %1443 = vmatprep.subr.bf16.mxu0 %v2405_v27  ;;  %v2495_v6 = vld [vmem:[#allocation8 + $0xe8] sm:$0xff]   ;;  %v2486_v27 = vld [vmem:[#allocation8 + $0x10] sm:$0xff]  }
  0xc4   :  { %1484 = vmatprep.subr.bf16.mxu1 %v2408_v28  ;;  %v2496_v28 = vld [vmem:[#allocation8 + $0xa8] sm:$0xff]  }
  0xc6   :  { %1444 = vmatpush1.bf16.msra.mxu0 %v2403_v29  ;;  %v2487_v29 = vld [vmem:[#allocation8 + $0x48] sm:$0xff]  }
  0xc7   :  { %1485 = vmatpush1.bf16.msra.mxu1 %v2406_v30  ;;  %1445 = vmatprep.subr.bf16.mxu0 %v2411_v31  ;;  %v2497_v30 = vld [vmem:[#allocation8 + $0xe0] sm:$0xff]   ;;  %v2488_v31 = vld [vmem:[#allocation8 + $0x8] sm:$0xff]  }
  0xc8   :  { %1486 = vmatprep.subr.bf16.mxu1 %v2414_v51  ;;  %v2498_v51 = vld [vmem:[#allocation8 + $0xa0] sm:$0xff]  }
  0xca   :  { %1446 = vmatpush1.bf16.msra.mxu0 %v2409_v32  ;;  %v2489_v32 = vld [vmem:[#allocation8 + $0x40] sm:$0xff]  }
  0xcb   :  { %1487 = vmatpush1.bf16.msra.mxu1 %v2412_v33  ;;  %1447 = vmatprep.subr.bf16.mxu0 %v2417_v34  ;;  %v2499_v33 = vld [vmem:[#allocation8 + $0xd8] sm:$0xff]   ;;  %v2490_v34 = vld [vmem:[#allocation8] sm:$0xff]  }
  0xcc   :  { %1488 = vmatprep.subr.bf16.mxu1 %v2420_v35  ;;  %v2500_v35 = vld [vmem:[#allocation8 + $0x98] sm:$0xff]  }
  0xce   :  { %1448 = vmatpush1.bf16.msra.mxu0 %v2415_v36  ;;  %v2501_v36 = vld [vmem:[#allocation8 + $0xd0] sm:$0xff]  }
  0xcf   :  { %1489 = vmatpush1.bf16.msra.mxu1 %v2418_v37  ;;  %1449 = vmatprep.subr.bf16.mxu0 %v2423_v38  ;;  %v2502_v37 = vld [vmem:[#allocation8 + $0x90] sm:$0xff]  }
  0xd0   :  { %1490 = vmatprep.subr.bf16.mxu1 %v2426_v39 }
  0xd2   :  { %1450 = vmatpush1.bf16.msra.mxu0 %v2421_v40 }
  0xd3   :  { %1491 = vmatpush1.bf16.msra.mxu1 %v2424_v41  ;;  %1451 = vmatprep.subr.bf16.mxu0 %v2429_v42  ;;  %v2503_v42 = vld [vmem:[#allocation8 + $0xc8] sm:$0xff]  }
  0xd4   :  { %1492 = vmatprep.subr.bf16.mxu1 %v2432_v43  ;;  %v2504_v43 = vld [vmem:[#allocation8 + $0x88] sm:$0xff]  }
  0xd6   :  { %1452 = vmatpush2.bf16.msra.mxu0 %v2427_v44 }
  0xd7   :  { %1493 = vmatpush2.bf16.msra.mxu1 %v2430_v45  ;;  %1453 = vmatprep.subr.bf16.mxu0 %v2435_v46 }
  0xd8   :  { %1494 = vmatprep.subr.bf16.mxu1 %v2438_v47 }
  0xda   :  { %1454 = vmatpush2.bf16.msra.mxu0 %v2433_v48  ;;  %v2505_v48 = vld [vmem:[#allocation8 + $0xc0] sm:$0xff]  }
  0xdb   :  { %1495 = vmatpush2.bf16.msra.mxu1 %v2436_v49  ;;  %1455 = vmatprep.subr.bf16.mxu0 %v2441_v50  ;;  %v2506_v49 = vld [vmem:[#allocation8 + $0x80] sm:$0xff]   ;;  %v270_v50 = vlaneseq }
  0xdc   :  { %1496 = vmatprep.subr.bf16.mxu1 %v2444_v52 }
  0xdd   :  { %v271_v52 = vshrl.u32 %v270_v50, 7 }
  0xde   :  { %1456 = vmatpush2.bf16.msra.mxu0 %v2439_v53 }
  0xdf   :  { %1497 = vmatpush2.bf16.msra.mxu1 %v2442_v54  ;;  %1457 = vmatprep.subr.bf16.mxu0 %v2447_v55  ;;  %v272_v53 = vsub.s32 0, %v271_v52  ;;  %v268_v54 = vld [vmem:[#allocation7] sm:$0xf]  ;;  %v276_v55 = vsub.s32 1, %v271_v52 }
  0xe0   :  { %1498 = vmatprep.subr.bf16.mxu1 %v2450_v56 }
  0xe1   :  { %v273_v56 = vrot.slane %v268_v54, %v272_v53 }
  0xe2   :  { %1458 = vmatpush2.bf16.msra.mxu0 %v2445_v57  ;;  %v277_v57 = vrot.slane %v268_v54, %v276_v55 }
  0xe3   :  { %1499 = vmatpush2.bf16.msra.mxu1 %v2448_v58  ;;  %1459 = vmatprep.subr.bf16.mxu0 %v2453_v59 }
  0xe4   :  { %1500 = vmatprep.subr.bf16.mxu1 %v2456_v60 }
  0xe6   :  { %1460 = vmatpush2.bf16.msra.mxu0 %v2451_v61 }
  0xe7   :  { %1501 = vmatpush2.bf16.msra.mxu1 %v2454_v62  ;;  %1461 = vmatprep.subr.bf16.mxu0 %v2459_v63 }
  0xe8   :  { %1502 = vmatprep.subr.bf16.mxu1 %v2462_v0 }
  0xea   :  { %1462 = vmatpush2.bf16.msra.mxu0 %v2457_v1 }
  0xeb   :  { %1503 = vmatpush2.bf16.msra.mxu1 %v2460_v2  ;;  %1463 = vmatprep.subr.bf16.mxu0 %v2465_v3 }
  0xec   :  { %1504 = vmatprep.subr.bf16.mxu1 %v2468_v4 }
  0xee   :  { %1464 = vmatpush2.bf16.msra.mxu0 %v2463_v5 }
  0xef   :  { %1505 = vmatpush2.bf16.msra.mxu1 %v2466_v8  ;;  %1465 = vmatprep.subr.bf16.mxu0 %v2471_v9 }
  0xf0   :  { %1506 = vmatprep.subr.bf16.mxu1 %v2474_v10 }
  0xf2   :  { %1466 = vmatpush2.bf16.msra.mxu0 %v2469_v11 }
  0xf3   :  { %1507 = vmatpush2.bf16.msra.mxu1 %v2472_v12  ;;  %2128 = vmatprep.subr.bf16.mxu0 %v2475_v14 }
  0xf4   :  { %2150 = vmatprep.subr.bf16.mxu1 %v2491_v23 }
  0xf5   :  { %1468 = vmatmul.mubr.bf16.vlgmr.msra.gmra.mxu0 %v2678_v7  ;;  %v2484_v7 = vld [vmem:[#allocation8 + $0x18] sm:$0xff]  }
  0xf6   :  { %1509 = vmatmul.mubr.bf16.vlgmr.msra.gmra.mxu1 %v2692_v13  ;;  %2129 = vmatpush3.bf16.msra.mxu0 %v2476_v15  ;;  %v2494_v13 = vld [vmem:[#allocation8 + $0xb0] sm:$0xff]   ;;  %v280_v15 = vsub.s32 2, %v271_v52 }
  0xf7   :  { %2130 = vmatprep.subr.bf16.mxu0 %v2477_v16  ;;  %2151 = vmatpush3.bf16.msra.mxu1 %v2492_v24  ;;  %v284_v16 = vsub.s32 3, %v271_v52 }
  0xf8   :  { %2152 = vmatprep.subr.bf16.mxu1 %v2493_v25 }
  0xfa   :  { %2131 = vmatpush3.bf16.msra.mxu0 %v2478_v17  ;;  %v281_v17 = vrot.slane %v268_v54, %v280_v15 }
  0xfb   :  { %2132 = vmatprep.subr.bf16.mxu0 %v2479_v18  ;;  %2153 = vmatpush3.bf16.msra.mxu1 %v2494_v13  ;;  %v285_v18 = vrot.slane %v268_v54, %v284_v16 }
  0xfc   :  { %2154 = vmatprep.subr.bf16.mxu1 %v2495_v6 }
  0xfe   :  { %2133 = vmatpush3.bf16.msra.mxu0 %v2480_v19 }
  0xff   :  { %2134 = vmatprep.subr.bf16.mxu0 %v2481_v20  ;;  %2155 = vmatpush3.bf16.msra.mxu1 %v2496_v28 }
 0x100   :  { %2156 = vmatprep.subr.bf16.mxu1 %v2497_v30 }
 0x102   :  { %2135 = vmatpush3.bf16.msra.mxu0 %v2482_v21 }
 0x103   :  { %2136 = vmatprep.subr.bf16.mxu0 %v2483_v22  ;;  %2157 = vmatpush3.bf16.msra.mxu1 %v2498_v51 }
 0x104   :  { %2158 = vmatprep.subr.bf16.mxu1 %v2499_v33 }
 0x106   :  { %2137 = vmatpush3.bf16.msra.mxu0 %v2484_v7 }
 0x107   :  { %2138 = vmatprep.subr.bf16.mxu0 %v2485_v26  ;;  %2159 = vmatpush3.bf16.msra.mxu1 %v2500_v35 }
 0x108   :  { %2160 = vmatprep.subr.bf16.mxu1 %v2501_v36 }
 0x10a   :  { %2139 = vmatpush3.bf16.msra.mxu0 %v2486_v27 }
 0x10b   :  { %2140 = vmatprep.subr.bf16.mxu0 %v2487_v29  ;;  %2161 = vmatpush3.bf16.msra.mxu1 %v2502_v37 }
 0x10c   :  { %2162 = vmatprep.subr.bf16.mxu1 %v2503_v42 }
 0x10e   :  { %2141 = vmatpush3.bf16.msra.mxu0 %v2488_v31 }
 0x10f   :  { %2142 = vmatprep.subr.bf16.mxu0 %v2489_v32  ;;  %2163 = vmatpush3.bf16.msra.mxu1 %v2504_v43 }
 0x110   :  { %2164 = vmatprep.subr.bf16.mxu1 %v2505_v48 }
 0x112   :  { %2143 = vmatpush3.bf16.msra.mxu0 %v2490_v34 }
 0x113   :  { %2165 = vmatpush3.bf16.msra.mxu1 %v2506_v49 }
 0x135   :  { %v1305_v38 = vpop.f32.mrf.mxu0 }
 0x136   :  { %v1346_v39 = vpop.f32.mrf.mxu1  ;;  %v1306_v58 = vadd.f32 %v1305_v38, %v273_v56  ;;  %v2095_v38 = vld [vmem:[%s2710_s4] ss:$0 sm:$0xff]  ;;  %s1886_s4 = sshll.u32 %s2627_s15, 4  ;;  %s1887_s4 = int_to_ptr.vmem [resolvable:$true] %s1886_s4 }
 0x137   :  { %v1307_v40 = vpop.f32.mrf.mxu0  ;;  %s2591_s16 = scalar_lea.vmem %s1887_s4, 64  ;;  %p2596_p7 = scmp.lt.s32.totalorder %s1887_s4, %s1887_s4 }
 0x138   :  { %v1348_v41 = vpop.f32.mrf.mxu1  ;;  %v1308_v59 = vadd.f32 %v1307_v40, %v277_v57  ;;  %v1347_v60 = vadd.f32 %v1346_v39, %v1306_v58  ;;  %p2592_p6 = scmp.ne.s32.totalorder %s1887_s4, %s2591_s16  ;;  %p2597_p8 = scmp.lt.s32.totalorder %s2591_s16, %s2591_s16 }
 0x139   :  { %v1309_v44 = vpop.f32.mrf.mxu0 }
 0x13a   :  { %v1350_v45 = vpop.f32.mrf.mxu1  ;;  %v1349_v63 = vadd.f32 %v1348_v41, %v1308_v59  ;;  %p2598_p9 = por %p2597_p8, %p2596_p7 }
 0x13b   :  { %v1310_v46 = vpop.f32.mrf.mxu0 }
 0x13c   :  { %v1351_v47 = vpop.f32.mrf.mxu1  ;;  %p2599_p10 = pnand %p2598_p9, %p2592_p6 }
 0x175   :  { %v1387_v61 = vpop.f32.mrf.mxu0 }
 0x176   :  { %v1428_v62 = vpop.f32.mrf.mxu1  ;;  %v1388_v0 = vadd.f32 %v1387_v61, %v1347_v60 }
 0x177   :  { %v1389_v1 = vpop.f32.mrf.mxu0  ;;  %v1429_v19 = vadd.f32 %v1428_v62, %v281_v17 }
 0x178   :  { %v1430_v2 = vpop.f32.mrf.mxu1  ;;  %v1390_v3 = vadd.f32 %v1389_v1, %v1349_v63  ;;  %v1517_v4 = vmax.f32 %v1388_v0, 0.0 }
 0x179   :  { %v1391_v5 = vpop.f32.mrf.mxu0  ;;  %v1431_v22 = vadd.f32 %v1430_v2, %v285_v18 }
 0x17a   :  { %v1432_v8 = vpop.f32.mrf.mxu1  ;;  %v1518_v9 = vmax.f32 %v1390_v3, 0.0  ;;  %v1521_v14 = vpack.c.bf16 %v1517_v4, %v1517_v4 }
 0x17b   :  { %v1392_v10 = vpop.f32.mrf.mxu0 }
 0x17c   :  { %v1433_v11 = vpop.f32.mrf.mxu1  ;;  %v1522_v12 = vpack.c.bf16 %v1518_v9, %v1518_v9 }
 0x17e   :  { %1820 = vmatprep.mubr.bf16.mxu0 %v1522_v12 }
 0x17f   :  { %1821 = vmatmul.mubr.bf16.vlgmr.msra.gmra.mxu0 %v1521_v14 }
 0x1b5   :  { %v1469_v20 = vpop.f32.mrf.mxu0 }
 0x1b6   :  { %v1510_v21 = vpop.f32.mrf.mxu1  ;;  %v1470_v23 = vadd.f32 %v1469_v20, %v1429_v19 }
 0x1b7   :  { %v1471_v24 = vpop.f32.mrf.mxu0 }
 0x1b8   :  { %v1512_v25 = vpop.f32.mrf.mxu1  ;;  %v1511_v7 = vadd.f32 %v1510_v21, %v1470_v23  ;;  %v1472_v13 = vadd.f32 %v1471_v24, %v1431_v22 }
 0x1b9   :  { %v1473_v26 = vpop.f32.mrf.mxu0 }
 0x1ba   :  { %v1514_v6 = vpop.f32.mrf.mxu1  ;;  %v1513_v27 = vadd.f32 %v1512_v25, %v1472_v13  ;;  %v1519_v28 = vmax.f32 %v1511_v7, 0.0 }
 0x1bb   :  { %v1474_v29 = vpop.f32.mrf.mxu0 }
 0x1bc   :  { %v1515_v30 = vpop.f32.mrf.mxu1  ;;  %v1520_v31 = vmax.f32 %v1513_v27, 0.0  ;;  %v1523_v32 = vpack.c.bf16 %v1519_v28, %v1519_v28 }
 0x1be   :  { %v1524_v51 = vpack.c.bf16 %v1520_v31, %v1520_v31 }
 0x1c0   :  { %1860 = vmatprep.mubr.bf16.mxu1 %v1524_v51 }
 0x1c1   :  { %1861 = vmatmul.mubr.bf16.vlgmr.msra.gmra.mxu1 %v1523_v32 }
 0x23f   :  { %v2144_v33 = vpop.f32.mrf.mxu0 }
 0x241   :  { %v2145_v34 = vpop.f32.mrf.mxu0 }
 0x242   :  { %v2146_v35 = vadd.f32 %v2145_v34, %v2144_v33 }
 0x243   :  { %v2147_v36 = vpop.f32.mrf.mxu0 }
 0x244   :  { %v1823_v41 = vadd.f32 %v2146_v35, %v2095_v38 }
 0x245   :  { %v2148_v37 = vpop.f32.mrf.mxu0 }
 0x281   :  { %v2166_v39 = vpop.f32.mrf.mxu1 }
 0x283   :  { %v2167_v40 = vpop.f32.mrf.mxu1 }
 0x284   :  { %v2168_v42 = vadd.f32 %v2167_v40, %v2166_v39 }
 0x285   :  { %v2169_v43 = vpop.f32.mrf.mxu1 }
 0x286   :  { %v1863_v44 = vadd.f32 %v2168_v42, %v1823_v41 }
 0x287   :  { %v2170_v45 = vpop.f32.mrf.mxu1 }
 0x288   :  { %1868 = vmax.xlane.f32.xlu0 %v1863_v44 }
 0x311   :  { %v1869_v46 = vpop.xlane.xlu0 %1868 }
 0x312   :  { %v1870_v47 = vsub.f32 %v1863_v44, %v1869_v46 }
 0x314   :  { %v1871_v48 = vmul.f32 1.442695, %v1870_v47 }
 0x316   :  { %2507 = vpow2.f32 %v1871_v48 }
 0x323   :  { %v2508_v49 = vpop.eup %2507 }
 0x324   :  { %1873 = vadd.xlane.f32.xlu0 %v2508_v49 }
 0x3ad   :  { %v1874_v50 = vpop.xlane.xlu0 %1873 }
 0x3ae   :  { %2509 = vlog2.f32 %v1874_v50 }
 0x3bb   :  { %v2510_v52 = vpop.eup %2509 }
 0x3bc   :  { %v1876_v53 = vmul.f32 0.6931472, %v2510_v52 }
 0x3be   :  { %v1877_v54 = vsub.f32 %v1870_v47, %v1876_v53 }
 0x3c0   :  { %v1878_v55 = vpack.c.bf16 %v1877_v54, %v1877_v54 }
 0x3c2   :  { %1879 = vst [vmem:[#allocation10] sm:$0xf] %v1878_v55 }
 0x3c3   :  { %2602 = shalt.err (!%p2599_p10)
}
 0x3c4   :  { %1889 = dma.vmem_to_hbm [thread:$0]  %s1887_s4, 64, %s2711_s5, [#allocation4]  }
 0x3c5   :  { %2617 = dma.done.wait [#allocation4], 64  }
 0x3c6   :  { %2618 = vsyncadd [#allocation4], 4294967232 }
 0x3c7   :  { %1893 = vsyncpa [#allocation3], 1 }
 0x3c8   :  { %1894 = vsyncpa [#allocation6], 1 }
 0x3c9   :  { %1895 = vsyncpa [#allocation9], 1 }
 0x3ca   :  { %1896 = vsyncpa [#allocation4], 1 }

</bundles_post_ra>
